<compile_context>
chip_gen: v5e
topology: v5e:2x2
jax: 0.10.0
libtpu: 0.0.40
codegen_flags: <defaults>
</compile_context>

<pallas_src>
import functools

import jax
import jax.numpy as jnp
from jax.experimental import pallas as pl
from jax.experimental.pallas import tpu as pltpu

LANES = 128  # vreg lane width


def _round_up(n, m):
    return ((n + m - 1) // m) * m


def _int_pow(x, n):
    """x ** n for a positive Python int n using repeated squaring (VPU only)."""
    acc = None
    base = x
    while n > 0:
        if n & 1:
            acc = base if acc is None else acc * base
        n >>= 1
        if n:
            base = base * base
    return acc


def _focal_loss_kernel(x_ref, t_ref, out_ref, *, alpha, gamma, size_average,
                       n_valid, block_rows, need_mask):
    step = pl.program_id(0)

    x = x_ref[...].astype(jnp.float32)
    t = t_ref[...].astype(jnp.float32)

    # P = sigmoid(x)
    p = jax.nn.sigmoid(x)

    # pt = (1 - P) * t + P * (1 - t)
    pt = (1.0 - p) * t + p * (1.0 - t)

    # focal_weight = (alpha * t + (1 - alpha) * (1 - t)) * pt ** gamma
    g = float(gamma)
    if g == 0.0:
        pow_pt = jnp.ones_like(pt)
    elif g.is_integer() and g > 0:
        pow_pt = _int_pow(pt, int(g))          # stays on the VPU
    else:
        pow_pt = pt ** g                        # non-integer gamma fallback (EUP)
    focal_weight = (alpha * t + (1.0 - alpha) * (1.0 - t)) * pow_pt

    # binary_cross_entropy_with_logits(x, t, reduction='none')
    #   = max(x, 0) - x*t + log1p(exp(-|x|))
    # Reuse the sigmoid: log1p(exp(-|x|)) == -log(where(x >= 0, p, 1 - p)),
    # saving one exp on the EUP.
    log_term = jnp.log(jnp.where(x >= 0.0, p, 1.0 - p))
    bce = jnp.maximum(x, 0.0) - x * t - log_term

    loss = bce * focal_weight

    if need_mask:
        rows = jax.lax.broadcasted_iota(jnp.int32, loss.shape, 0) + step * block_rows
        cols = jax.lax.broadcasted_iota(jnp.int32, loss.shape, 1)
        flat = rows * LANES + cols
        loss = jnp.where(flat < n_valid, loss, 0.0)

    @pl.when(step == 0)
    def _():
        out_ref[...] = jnp.zeros_like(out_ref)

    out_ref[...] += jnp.sum(loss)

    @pl.when(step == pl.num_programs(0) - 1)
    def _():
        if size_average:
            out_ref[...] = out_ref[...] * jnp.float32(1.0 / n_valid)


def focal_loss(inputs, targets, alpha=0.25, gamma=2, size_average=True,
               block_rows=512):
    """Pallas TPU focal loss. inputs, targets: shape (B,). Returns scalar f32."""
    assert inputs.shape == targets.shape and inputs.ndim == 1
    assert block_rows % 8 == 0
    b = inputs.shape[0]

    rows = pl.cdiv(b, LANES)
    if rows <= block_rows:
        # Small problem: a single block (rounded to full sublanes), grid of 1.
        br = _round_up(max(rows, 1), 8)
        rows_padded = br
    else:
        br = block_rows
        rows_padded = _round_up(rows, br)

    padded = rows_padded * LANES
    need_mask = padded != b

    x = inputs
    t = targets
    if padded != b:
        x = jnp.pad(x, (0, padded - b))
        t = jnp.pad(t, (0, padded - b))
    # Lane- and sublane-dense slab; keep native dtype (upcast happens in-kernel).
    x2 = x.reshape(rows_padded, LANES)
    t2 = t.reshape(rows_padded, LANES)

    kernel = functools.partial(
        _focal_loss_kernel,
        alpha=float(alpha),
        gamma=gamma,
        size_average=bool(size_average),
        n_valid=b,
        block_rows=br,
        need_mask=need_mask,
    )

    grid = (rows_padded // br,)

    out = pl.pallas_call(
        kernel,
        out_shape=jax.ShapeDtypeStruct((1, 1), jnp.float32),
        grid_spec=pltpu.PrefetchScalarGridSpec(
            num_scalar_prefetch=0,
            grid=grid,
            in_specs=[
                pl.BlockSpec((br, LANES), lambda i: (i, 0)),
                pl.BlockSpec((br, LANES), lambda i: (i, 0)),
            ],
            out_specs=pl.BlockSpec((1, 1), lambda i: (0, 0)),
        ),
        compiler_params=pltpu.CompilerParams(
            dimension_semantics=("arbitrary",),  # reduction axis (accumulator)
        ),
    )(x2, t2)
    return out[0, 0]


def _focal_loss_ref(inputs, targets, alpha=0.25, gamma=2, size_average=True):
    """Pure-JAX reference mirroring the PyTorch module exactly."""
    x = inputs.astype(jnp.float32)
    t = targets.astype(jnp.float32)
    p = jax.nn.sigmoid(x)
    pt = (1.0 - p) * t + p * (1.0 - t)
    fw = (alpha * t + (1.0 - alpha) * (1.0 - t)) * (pt ** gamma)
    bce = jnp.maximum(x, 0.0) - x * t + jnp.log1p(jnp.exp(-jnp.abs(x)))
    loss = bce * fw
    return jnp.mean(loss) if size_average else jnp.sum(loss)


if __name__ == "__main__":
    key = jax.random.PRNGKey(0)
    k1, k2, k3, k4 = jax.random.split(key, 4)

    # Tiny B matching the module contract "input: (B), target: (B)".
    B = 8
    x_small = jax.random.normal(k1, (B,), dtype=jnp.float32) * 2.0
    t_small = jax.random.bernoulli(k2, p=0.5, shape=(B,)).astype(jnp.float32)

    out_mean = jax.block_until_ready(focal_loss(x_small, t_small))
    ref_mean = _focal_loss_ref(x_small, t_small)
    assert jnp.allclose(out_mean, ref_mean, rtol=1e-5, atol=1e-5), (out_mean, ref_mean)

    out_sum = jax.block_until_ready(
        focal_loss(x_small, t_small, size_average=False))
    ref_sum = _focal_loss_ref(x_small, t_small, size_average=False)
    assert jnp.allclose(out_sum, ref_sum, rtol=1e-5, atol=1e-5), (out_sum, ref_sum)

    # Larger, non-multiple-of-1024 B with a multi-step grid (small block_rows to
    # exercise tiling, the resident accumulator, and masking of the padded tail).
    B2 = 3000
    x_big = jax.random.normal(k3, (B2,), dtype=jnp.float32) * 3.0
    t_big = jax.random.bernoulli(k4, p=0.3, shape=(B2,)).astype(jnp.float32)

    out_big = jax.block_until_ready(focal_loss(x_big, t_big, block_rows=8))
    ref_big = _focal_loss_ref(x_big, t_big)
    assert jnp.allclose(out_big, ref_big, rtol=1e-5, atol=1e-5), (out_big, ref_big)

    print("KERNEL_OK")
</pallas_src>

<mosaic_0001>
module attributes {stable_mosaic.version = 11 : i64} {
  func.func @_focal_loss_kernel(%arg0: i32, %arg1: memref<8x128xf32, #tpu.memory_space<vmem>>, %arg2: memref<8x128xf32, #tpu.memory_space<vmem>>, %arg3: memref<1x1xf32, #tpu.memory_space<vmem>>) attributes {dimension_semantics = [#tpu.dimension_semantics<arbitrary>], iteration_bounds = array<i64: 1>, scalar_prefetch = 0 : i64, scratch_operands = 0 : i64, tpu.core_type = #tpu.core_type<tc>, window_params = [{transform_indices = @transform_0, window_bounds = array<i64: 8, 128>}, {transform_indices = @transform_1, window_bounds = array<i64: 8, 128>}, {pipeline_mode = #tpu.pipeline_mode<synchronous>, transform_indices = @transform_2, window_bounds = array<i64: 1, 1>}]} {
    %c0 = arith.constant 0 : index
    %c0_0 = arith.constant 0 : index
    %0 = vector.load %arg1[%c0, %c0_0] : memref<8x128xf32, #tpu.memory_space<vmem>>, vector<8x128xf32>
    %c0_1 = arith.constant 0 : index
    %c0_2 = arith.constant 0 : index
    %1 = vector.load %arg2[%c0_1, %c0_2] : memref<8x128xf32, #tpu.memory_space<vmem>>, vector<8x128xf32>
    %2 = arith.negf %0 : vector<8x128xf32>
    %3 = math.exp %2 : vector<8x128xf32>
    %cst = arith.constant 1.000000e+00 : f32
    %4 = vector.broadcast %cst : f32 to vector<8x128xf32>
    %5 = arith.addf %4, %3 : vector<8x128xf32>
    %6 = arith.divf %4, %5 : vector<8x128xf32>
    %cst_3 = arith.constant 1.000000e+00 : f32
    %7 = vector.broadcast %cst_3 : f32 to vector<8x128xf32>
    %8 = arith.subf %7, %6 : vector<8x128xf32>
    %9 = arith.mulf %8, %1 : vector<8x128xf32>
    %cst_4 = arith.constant 1.000000e+00 : f32
    %10 = vector.broadcast %cst_4 : f32 to vector<8x128xf32>
    %11 = arith.subf %10, %1 : vector<8x128xf32>
    %12 = arith.mulf %6, %11 : vector<8x128xf32>
    %13 = arith.addf %9, %12 : vector<8x128xf32>
    %14 = arith.mulf %13, %13 : vector<8x128xf32>
    %cst_5 = arith.constant 2.500000e-01 : f32
    %15 = vector.broadcast %cst_5 : f32 to vector<8x128xf32>
    %16 = arith.mulf %15, %1 : vector<8x128xf32>
    %cst_6 = arith.constant 1.000000e+00 : f32
    %17 = vector.broadcast %cst_6 : f32 to vector<8x128xf32>
    %18 = arith.subf %17, %1 : vector<8x128xf32>
    %cst_7 = arith.constant 7.500000e-01 : f32
    %19 = vector.broadcast %cst_7 : f32 to vector<8x128xf32>
    %20 = arith.mulf %19, %18 : vector<8x128xf32>
    %21 = arith.addf %16, %20 : vector<8x128xf32>
    %22 = arith.mulf %21, %14 : vector<8x128xf32>
    %cst_8 = arith.constant 0.000000e+00 : f32
    %23 = vector.broadcast %cst_8 : f32 to vector<8x128xf32>
    %24 = arith.cmpf oge, %0, %23 : vector<8x128xf32>
    %cst_9 = arith.constant 1.000000e+00 : f32
    %25 = vector.broadcast %cst_9 : f32 to vector<8x128xf32>
    %26 = arith.subf %25, %6 : vector<8x128xf32>
    %27 = arith.select %24, %6, %26 : vector<8x128xi1>, vector<8x128xf32>
    %28 = math.log %27 : vector<8x128xf32>
    %cst_10 = arith.constant 0.000000e+00 : f32
    %29 = vector.broadcast %cst_10 : f32 to vector<8x128xf32>
    %30 = arith.maximumf %0, %29 : vector<8x128xf32>
    %31 = arith.mulf %0, %1 : vector<8x128xf32>
    %32 = arith.subf %30, %31 : vector<8x128xf32>
    %33 = arith.subf %32, %28 : vector<8x128xf32>
    %34 = arith.mulf %33, %22 : vector<8x128xf32>
    %35 = tpu.iota {dimensions = array<i32: 0>} : vector<8x128xi32>
    %c8_i32 = arith.constant 8 : i32
    %36 = arith.muli %arg0, %c8_i32 : i32
    %37 = vector.broadcast %36 : i32 to vector<8x128xi32>
    %38 = arith.addi %35, %37 : vector<8x128xi32>
    %39 = tpu.iota {dimensions = array<i32: 1>} : vector<8x128xi32>
    %c128_i32 = arith.constant 128 : i32
    %40 = vector.broadcast %c128_i32 : i32 to vector<8x128xi32>
    %41 = arith.muli %38, %40 : vector<8x128xi32>
    %42 = arith.addi %41, %39 : vector<8x128xi32>
    %c8_i32_11 = arith.constant 8 : i32
    %43 = vector.broadcast %c8_i32_11 : i32 to vector<8x128xi32>
    %44 = arith.cmpi slt, %42, %43 : vector<8x128xi32>
    %cst_12 = arith.constant 0.000000e+00 : f32
    %45 = vector.broadcast %cst_12 : f32 to vector<8x128xf32>
    %46 = arith.select %44, %34, %45 : vector<8x128xi1>, vector<8x128xf32>
    %c0_i32 = arith.constant 0 : i32
    %47 = arith.cmpi eq, %arg0, %c0_i32 : i32
    %48 = arith.extui %47 : i1 to i32
    %c0_i32_13 = arith.constant 0 : i32
    %49 = arith.cmpi ne, %48, %c0_i32_13 : i32
    scf.if %49 {
      %cst_21 = arith.constant 0.000000e+00 : f32
      %61 = vector.broadcast %cst_21 : f32 to vector<1x1xf32>
      %c0_22 = arith.constant 0 : index
      %c0_23 = arith.constant 0 : index
      %62 = vector.load %arg3[%c0_22, %c0_23] : memref<1x1xf32, #tpu.memory_space<vmem>>, vector<1x1xf32>
      tpu.vector_store %arg3[%c0_22, %c0_23], %61 {strides = array<i32>} : memref<1x1xf32, #tpu.memory_space<vmem>>, vector<1x1xf32>,
    } else {
    }
    %c0_14 = arith.constant 0 : index
    %c0_15 = arith.constant 0 : index
    %50 = vector.load %arg3[%c0_14, %c0_15] : memref<1x1xf32, #tpu.memory_space<vmem>>, vector<1x1xf32>
    %51 = vector.shape_cast %46 : vector<8x128xf32> to vector<1x8x128xf32>
    %cst_16 = arith.constant dense<0.000000e+00> : vector<1xf32>
    %52 = vector.multi_reduction <add>, %51, %cst_16 [1, 2] : vector<1x8x128xf32> to vector<1xf32>
    %53 = vector.shape_cast %52 : vector<1xf32> to vector<1x1x1xf32>
    %54 = vector.extract %53[0, 0, 0] : f32 from vector<1x1x1xf32>
    %55 = vector.broadcast %54 : f32 to vector<1x1xf32>
    %56 = arith.addf %50, %55 : vector<1x1xf32>
    %c0_17 = arith.constant 0 : index
    %c0_18 = arith.constant 0 : index
    %57 = vector.load %arg3[%c0_17, %c0_18] : memref<1x1xf32, #tpu.memory_space<vmem>>, vector<1x1xf32>
    tpu.vector_store %arg3[%c0_17, %c0_18], %56 {strides = array<i32>} : memref<1x1xf32, #tpu.memory_space<vmem>>, vector<1x1xf32>,
    %c0_i32_19 = arith.constant 0 : i32
    %58 = arith.cmpi eq, %arg0, %c0_i32_19 : i32
    %59 = arith.extui %58 : i1 to i32
    %c0_i32_20 = arith.constant 0 : i32
    %60 = arith.cmpi ne, %59, %c0_i32_20 : i32
    scf.if %60 {
      %c0_21 = arith.constant 0 : index
      %c0_22 = arith.constant 0 : index
      %61 = vector.load %arg3[%c0_21, %c0_22] : memref<1x1xf32, #tpu.memory_space<vmem>>, vector<1x1xf32>
      %cst_23 = arith.constant 1.250000e-01 : f32
      %62 = vector.broadcast %cst_23 : f32 to vector<1x1xf32>
      %63 = arith.mulf %61, %62 : vector<1x1xf32>
      %c0_24 = arith.constant 0 : index
      %c0_25 = arith.constant 0 : index
      %64 = vector.load %arg3[%c0_24, %c0_25] : memref<1x1xf32, #tpu.memory_space<vmem>>, vector<1x1xf32>
      tpu.vector_store %arg3[%c0_24, %c0_25], %63 {strides = array<i32>} : memref<1x1xf32, #tpu.memory_space<vmem>>, vector<1x1xf32>,
    } else {
    }
    return
  }
  func.func @transform_0(%arg0: i32) -> (i32, i32) {
    %c0_i32 = arith.constant 0 : i32
    %c0_i32_0 = arith.constant 0 : i32
    return %arg0, %c0_i32 : i32, i32
  }
  func.func @transform_1(%arg0: i32) -> (i32, i32) {
    %c0_i32 = arith.constant 0 : i32
    %c0_i32_0 = arith.constant 0 : i32
    return %arg0, %c0_i32 : i32, i32
  }
  func.func @transform_2(%arg0: i32) -> (i32, i32) {
    %c0_i32 = arith.constant 0 : i32
    %c0_i32_0 = arith.constant 0 : i32
    %c0_i32_1 = arith.constant 0 : i32
    return %c0_i32, %c0_i32_0 : i32, i32
  }
}

</mosaic_0001>

<bundles_post_ra>
// kernel: tpu_custom_call.1
= control target key start
LH: loop header
LB: loop body
LE: loop exit
PB: predicated region body
PF: predicated region fallthrough
CT: control target
= control target key end

     0   :  { %7 = vsyncpa [#allocation3], 0  ;;  %s257_s0 = inlined_call_operand.hbm [shape: f32[8,128], index: 0, kind: input, shape index: {}]   ;;  %s258_s1 = inlined_call_operand.hbm [shape: f32[8,128], index: 1, kind: input, shape index: {}]   ;;  %s259_s2 = inlined_call_operand.hbm [shape: f32[1,1], index: 2, kind: output, shape index: {}]  }
   0x1   :  { %8 = vsyncpa [#allocation6], 0 }
   0x2   :  { %9 = vsyncpa [#allocation4], 0  ;;  %s15_s11 = sshll.u32 %s257_s0, 4  ;;  %s226_s12 = smov [#allocation2]   ;;  %s16_s11 = int_to_ptr.hbm [resolvable:$true] %s15_s11 }
   0x3   :  { %s17_s13 = sshll.u32 %s226_s12, 4  ;;  %s26_s16 = sshll.u32 %s258_s1, 4  ;;  %s18_s13 = int_to_ptr.vmem [resolvable:$true] %s17_s13  ;;  %s27_s16 = int_to_ptr.hbm [resolvable:$true] %s26_s16 }
   0x4   :  { %20 = dma.hbm_to_vmem [thread:$0]  %s16_s11, 128, %s18_s13, [#allocation3]  }
   0x5   :  { %s227_s17 = smov [#allocation5]  }
   0x6   :  { %s28_s18 = sshll.u32 %s227_s17, 4  ;;  %s29_s18 = int_to_ptr.vmem [resolvable:$true] %s28_s18 }
   0x7   :  { %31 = dma.hbm_to_vmem [thread:$0]  %s27_s16, 128, %s29_s18, [#allocation6]  }
   0x8   :  { %220 = dma.done.wait [#allocation3], 128  }
   0x9   :  { %221 = vsyncadd [#allocation3], 4294967168 }
   0xa   :  { %222 = dma.done.wait [#allocation6], 128  }
   0xb   :  { %223 = vsyncadd [#allocation6], 4294967168  ;;  %v40_v0 = vld [vmem:[#allocation2] sm:$0xff]  ;;  %v41_v9 = vld [vmem:[#allocation5] sm:$0xff]  ;;  %v80_v14 = vlaneseq  ;;  %vm95_vm6 = vcmask 0   ;;  %v228_v39 = vmov 0.0  }
   0xc   :  { %v135_v1 = vmul.f32 -1.442695, %v40_v0  ;;  %v63_v13 = vsub.f32 1.0, %v41_v9  ;;  %vm71_vm4 = vcmp.ge.f32.partialorder %v40_v0, 0.0  ;;  %v67_v21 = vmul.f32 0.25, %v41_v9  ;;  %s229_s1 = smov [#allocation7]  }
   0xd   :  { %v81_v19 = vshrl.u32 %v80_v14, 7  ;;  %v75_v25 = vmax.f32 %v40_v0, 0.0  ;;  %v76_v26 = vmul.f32 %v41_v9, %v40_v0  ;;  %v86_v27 = vand.u32 127, %v80_v14  ;;  %96 = vst.msk [vmem:[#allocation7] sm:$0x1] %vm95_vm6, %v228_v39  ;;  %s122_s19 = sshll.u32 %s229_s1, 4  ;;  %s123_s19 = int_to_ptr.vmem [resolvable:$true] %s122_s19 }
   0xe   :  { %142 = vpow2.f32 %v135_v1  ;;  %v68_v22 = vmul.f32 0.75, %v63_v13  ;;  %s124_s22 = sshll.u32 %s259_s2, 4  ;;  %s125_s22 = int_to_ptr.hbm [resolvable:$true] %s124_s22 }
   0xf   :  { %v87_v28 = vmul.u32 128, %v81_v19  ;;  %v77_v31 = vsub.f32 %v75_v25, %v76_v26 }
  0x10   :  { %v69_v30 = vadd.f32 %v68_v22, %v67_v21 }
  0x11   :  { %v88_v33 = vadd.s32 %v87_v28, %v86_v27 }
  0x13   :  { %vm89_vm5 = vcmp.lt.s32.totalorder %v88_v33, 8 }
  0x14   :  { %v143_v2 = vpop.eup %142  ;;  %v97_v47 = vld [vmem:[#allocation7] sm:$0x1] }
  0x15   :  { %v45_v3 = vadd.f32 1.0, %v143_v2 }
  0x17   :  { %144 = vrcp.f32 %v45_v3  ;;  %v57_v6 = vand.u32 2147483648, %v45_v3  ;;  %vm51_vm0 = vweird.f32 %v45_v3  ;;  %v55_v8 = vand.u32 2147483647, %v45_v3 }
  0x19   :  { %v58_v11 = vor.u32 1.1754944e-38, %v57_v6  ;;  %vm56_vm3 = vcmp.eq.f32.partialorder %v55_v8, 8.507059e+37 }
  0x1d   :  { %v145_v4 = vpop.eup %144 }
  0x1e   :  { %v47_v5 = vmul.f32 %v145_v4, %v45_v3  ;;  %vm52_vm1 = vweird.f32 %v145_v4 }
  0x1f   :  { %vm53_vm2 = vmor %vm51_vm0, %vm52_vm1 }
  0x20   :  { %v48_v7 = vsub.f32 1.0, %v47_v5 }
  0x22   :  { %v49_v10 = vmul.f32 %v145_v4, %v48_v7 }
  0x24   :  { %v50_v12 = vadd.f32 %v145_v4, %v49_v10 }
  0x26   :  { %v54_v15 = vsel %vm53_vm2, %v145_v4, %v50_v12 }
  0x27   :  { %v59_v16 = vsel %vm56_vm3, %v58_v11, %v54_v15 }
  0x28   :  { %v61_v17 = vsub.f32 1.0, %v59_v16  ;;  %v64_v18 = vmul.f32 %v63_v13, %v59_v16 }
  0x2a   :  { %v62_v20 = vmul.f32 %v61_v17, %v41_v9  ;;  %v72_v23 = vsel %vm71_vm4, %v59_v16, %v61_v17 }
  0x2b   :  { %146 = vlog2.f32 %v72_v23 }
  0x2c   :  { %v65_v24 = vadd.f32 %v64_v18, %v62_v20 }
  0x2e   :  { %v66_v29 = vmul.f32 %v65_v24, %v65_v24 }
  0x30   :  { %v70_v34 = vmul.f32 %v69_v30, %v66_v29 }
  0x31   :  { %v147_v32 = vpop.eup %146 }
  0x32   :  { %v74_v35 = vmul.f32 0.6931472, %v147_v32 }
  0x34   :  { %v78_v36 = vsub.f32 %v77_v31, %v74_v35 }
  0x36   :  { %v79_v37 = vmul.f32 %v78_v36, %v70_v34 }
  0x38   :  { %v90_v38 = vsel %vm89_vm5, %v79_v37, 0.0 }
  0x39   :  { %98 = vadd.xlane.f32.xlu0 %v90_v38 }
  0xac   :  { %v99_v40 = vpop.xlane.xlu0 %98 }
  0xad   :  { %v100_v41 = vrot.slane %v99_v40, 4 }
  0xaf   :  { %v101_v42 = vadd.f32 %v100_v41, %v99_v40 }
  0xb1   :  { %v102_v43 = vrot.slane %v101_v42, 2 }
  0xb3   :  { %v103_v44 = vadd.f32 %v102_v43, %v101_v42 }
  0xb5   :  { %v104_v45 = vrot.slane %v103_v44, 1 }
  0xb7   :  { %v105_v46 = vadd.f32 %v104_v45, %v103_v44 }
  0xb9   :  { %136 = vpush %v105_v46 }
  0xea   :  { %s137_s0 = spop %136 }
  0xeb   :  { %v107_v48 = vstv %s137_s0 }
  0xec   :  { %v108_v49 = vadd.f32 %v107_v48, %v97_v47 }
  0xee   :  { %110 = vst.msk [vmem:[#allocation7] sm:$0x1] %vm95_vm6, %v108_v49 }
  0xf5   :  { %v114_v50 = vld [vmem:[#allocation7] sm:$0x1] }
  0xf6   :  { %v115_v51 = vmul.f32 0.125, %v114_v50 }
  0xf8   :  { %116 = vst.msk [vmem:[#allocation7] sm:$0x1] %vm95_vm6, %v115_v51 }
  0xf9   :  { %127 = dma.vmem_to_hbm [thread:$0]  %s123_s19, 16, %s125_s22, [#allocation4]  }
  0xfa   :  { %224 = dma.done.wait [#allocation4], 16  }
  0xfb   :  { %225 = vsyncadd [#allocation4], 4294967280 }
  0xfc   :  { %132 = vsyncpa [#allocation3], 1 }
  0xfd   :  { %133 = vsyncpa [#allocation6], 1 }
  0xfe   :  { %134 = vsyncpa [#allocation4], 1 }

</bundles_post_ra>
